<compile_context>
chip_gen: v6e
topology: v6e:2x2x1
jax: 0.10.0
libtpu: 0.0.40
codegen_flags: <defaults>
</compile_context>

<pallas_src>
import functools

import jax
import jax.numpy as jnp
from jax.experimental import pallas as pl
from jax.experimental.pallas import tpu as pltpu

NUM_EMBEDDINGS = 20
LEAKY_SLOPE = 0.01          # torch.nn.LeakyReLU default
GINE_EPS = 1e-9             # GINEConv(eps=1e-09) in the module (no-op in f32)
HID1 = 64                   # conv1 nn: Linear(embed_dim, 64)
HID2 = 32                   # conv6 nn: Linear(64, 32)
LANES = 128


def _round_up(x, m):
    return (x + m - 1) // m * m


def _make_layout(embed_dim, edge_dim):
    """Row offsets (8-aligned) of each parameter section inside the packed slab."""
    d = embed_dim
    assert d + d + HID1 <= LANES, "block-diag head needs embed_dim + (embed_dim + 64) <= 128"
    # Head RHS rows: [emb one-hot rows (20) | edge_attr rows (edge_dim) | bias row (1)]
    kw = _round_up(NUM_EMBEDDINGS + edge_dim + 1, 8)
    r = kw
    w1_r = r; r = _round_up(r + d, 8)       # w1 : D x 64
    b1_r = r; r = _round_up(r + 1, 8)       # b1 : 1 x 64
    w2_r = r; r = _round_up(r + HID1, 8)    # w2 : 64 x 32
    b2_r = r; r = _round_up(r + 1, 8)       # b2 : 1 x 32
    return dict(d=d, edge_dim=edge_dim, h1=HID1, h2=HID2, kw=kw,
                w1_r=w1_r, b1_r=b1_r, w2_r=w2_r, b2_r=b2_r, rows=r)


def pack_params(params, embed_dim, edge_dim):
    """Pack all weights/biases into one lane-padded [rows, 128] f32 slab (done once)."""
    lay = _make_layout(embed_dim, edge_dim)
    d, h1, h2 = lay["d"], lay["h1"], lay["h2"]
    slab = jnp.zeros((lay["rows"], LANES), jnp.float32)

    # --- block-diagonal head RHS (rows 0:kw) ---------------------------------
    #   rows 0:20,            lanes 0:d        -> embedding table
    #   rows 20:20+edge_dim,  lanes d:2d+h1    -> [we1 | we2]
    #   row  20+edge_dim,     lanes d:2d+h1    -> [be1 | be2]  (hit by a ones column in LHS)
    slab = slab.at[0:NUM_EMBEDDINGS, 0:d].set(params["emb_table"])
    we12 = jnp.concatenate([params["we1"], params["we2"]], axis=1)       # [edge_dim, d+h1]
    be12 = jnp.concatenate([params["be1"], params["be2"]], axis=1)       # [1, d+h1]
    slab = slab.at[NUM_EMBEDDINGS:NUM_EMBEDDINGS + edge_dim, d:d + d + h1].set(we12)
    slab = slab.at[NUM_EMBEDDINGS + edge_dim, d:d + d + h1].set(be12[0])

    # --- node-nn linears ------------------------------------------------------
    slab = slab.at[lay["w1_r"]:lay["w1_r"] + d, 0:h1].set(params["w1"])
    slab = slab.at[lay["b1_r"], 0:h1].set(params["b1"][0])
    slab = slab.at[lay["w2_r"]:lay["w2_r"] + h1, 0:h2].set(params["w2"])
    slab = slab.at[lay["b2_r"], 0:h2].set(params["b2"][0])
    return slab, lay


def _latency_kernel(idx_ref, eattr_ref, slab_ref, out_ref, *, lay, n, e, col_rows):
    f32 = jnp.float32
    d, h1, h2, edge_dim, kw = lay["d"], lay["h1"], lay["h2"], lay["edge_dim"], lay["kw"]

    idx = idx_ref[0]                               # (pack_rows, E) int32
    eattr = eattr_ref[0]                           # (E, edge_dim) f32

    src_col = idx[0:e, 0:1]                        # (E, 1)  source node of each edge
    xid_col = idx[0:n, 1:2]                        # (N, 1)  item id of each node
    dst_row = idx[col_rows:col_rows + 1, :]        # (1, E)  target node of each edge

    # ---- selectors built on the VPU (iota compares), matmul-native layouts ---
    onehot_x = (jax.lax.broadcasted_iota(jnp.int32, (n, NUM_EMBEDDINGS), 1)
                == xid_col).astype(f32)                                   # (N, 20)
    gather_en = (jax.lax.broadcasted_iota(jnp.int32, (e, n), 1)
                 == src_col).astype(f32)                                  # (E, N): x[src] gather
    scatter_ne = (jax.lax.broadcasted_iota(jnp.int32, (n, e), 0)
                  == dst_row).astype(f32)                                 # (N, E): scatter-add

    # ---- head: block-diagonal fused matmul -----------------------------------
    # lhs = [[onehot_x, 0], [0, eattr, 1, 0]]   (N+E, kw)
    top = jnp.concatenate(
        [onehot_x, jnp.zeros((n, kw - NUM_EMBEDDINGS), f32)], axis=1)     # (N, kw)
    ones_col = (jax.lax.broadcasted_iota(
        jnp.int32, (e, kw - NUM_EMBEDDINGS - edge_dim), 1) == 0).astype(f32)
    bot = jnp.concatenate(
        [jnp.zeros((e, NUM_EMBEDDINGS), f32), eattr, ones_col], axis=1)   # (E, kw)
    lhs = jnp.concatenate([top, bot], axis=0)                             # (N+E, kw)

    w_head = slab_ref[0:kw, :]                                            # (kw, 128)
    fused = jnp.dot(lhs, w_head, preferred_element_type=f32)              # (N+E, 128)
    x0 = fused[0:n, 0:d]                                                  # (N, D)   embedded nodes
    e_rows = fused[n:n + e, :]                                            # (E, 128)
    e1 = e_rows[:, d:2 * d]                                               # (E, D)   edge proj conv1
    e2 = e_rows[:, 2 * d:2 * d + h1]                                      # (E, 64)  edge proj conv6

    def gine(x_in, e_proj, w, b):
        xj = jnp.dot(gather_en, x_in, preferred_element_type=f32)         # (E, F) = x[src]
        msg = jnp.maximum(xj + e_proj, 0.0)                               # ReLU(x_j + e)
        agg = jnp.dot(scatter_ne, msg, preferred_element_type=f32)        # (N, F) scatter-add
        upd = agg + (1.0 + GINE_EPS) * x_in
        return jnp.dot(upd, w, preferred_element_type=f32) + b

    # ---- GINEConv 1 + LeakyReLU ----------------------------------------------
    w1 = slab_ref[lay["w1_r"]:lay["w1_r"] + d, 0:h1]
    b1 = slab_ref[lay["b1_r"]:lay["b1_r"] + 1, 0:h1]
    h1_ = gine(x0, e1, w1, b1)                                            # (N, 64)
    h1_ = jnp.where(h1_ > 0, h1_, LEAKY_SLOPE * h1_)

    # ---- GINEConv 6 ------------------------------------------------------------
    w2 = slab_ref[lay["w2_r"]:lay["w2_r"] + h1, 0:h2]
    b2 = slab_ref[lay["b2_r"]:lay["b2_r"] + 1, 0:h2]
    h2_ = gine(h1_, e2, w2, b2)                                           # (N, 32)

    # ---- gram matrix s = x @ x.T, lane-dense store ----------------------------
    gram = jax.lax.dot_general(h2_, h2_, (((1,), (1,)), ((), ())),
                               preferred_element_type=f32)                # (N, N)
    out_ref[0] = jnp.concatenate(
        [gram, jnp.zeros((n, LANES - n), f32)], axis=1)                   # (N, 128) unmasked vst


def latency_model_forward(x_idx, edge_index, edge_attr, param_slab, lay):
    """Batched forward of B independent graphs.

    x_idx:      [B, N, 1] int32 item ids in [0, 20)
    edge_index: [B, 2, E] int32 (row 0 = src, row 1 = dst)
    edge_attr:  [B, E, edge_dim] f32
    param_slab: [rows, 128] f32 from pack_params
    Returns:    [B, N, N] f32 gram matrices.
    """
    b, n = x_idx.shape[0], x_idx.shape[1]
    e = edge_index.shape[2]
    edge_dim = edge_attr.shape[2]

    # ---- pack node ids + edge endpoints into one small int32 block (1 DMA) ----
    col_rows = max(n, e)
    pack_rows = _round_up(col_rows + 1, 8)
    idx_pack = jnp.zeros((b, pack_rows, e), jnp.int32)
    idx_pack = idx_pack.at[:, 0:e, 0].set(edge_index[:, 0, :])        # src as column 0
    idx_pack = idx_pack.at[:, 0:n, 1].set(x_idx[:, :, 0])             # node ids as column 1
    idx_pack = idx_pack.at[:, col_rows, :].set(edge_index[:, 1, :])   # dst as a row

    kernel = functools.partial(_latency_kernel, lay=lay, n=n, e=e, col_rows=col_rows)
    out_pad = pl.pallas_call(
        kernel,
        out_shape=jax.ShapeDtypeStruct((b, n, LANES), jnp.float32),
        grid=(b,),
        in_specs=[
            pl.BlockSpec((1, pack_rows, e), lambda i: (i, 0, 0)),
            pl.BlockSpec((1, e, edge_dim), lambda i: (i, 0, 0)),
            pl.BlockSpec((lay["rows"], LANES), lambda i: (0, 0)),     # slab: VMEM-resident
        ],
        out_specs=pl.BlockSpec((1, n, LANES), lambda i: (i, 0, 0)),
        compiler_params=pltpu.CompilerParams(dimension_semantics=("parallel",)),
    )(idx_pack, edge_attr.astype(jnp.float32), param_slab)
    return out_pad[:, :, :n]


def _reference_forward(x_idx, edge_index, edge_attr, params):
    """Pure-JAX reference of the PyTorch forward for a single graph."""
    x = params["emb_table"][x_idx[:, 0]]                              # [N, D]

    def gine(x_in, we, be, w, b):
        eproj = edge_attr @ we + be[0]
        msg = jnp.maximum(x_in[edge_index[0]] + eproj, 0.0)
        agg = jnp.zeros_like(x_in).at[edge_index[1]].add(msg)
        return (agg + (1.0 + GINE_EPS) * x_in) @ w + b[0]

    h1 = gine(x, params["we1"], params["be1"], params["w1"], params["b1"])
    h1 = jnp.where(h1 > 0, h1, LEAKY_SLOPE * h1)
    h2 = gine(h1, params["we2"], params["be2"], params["w2"], params["b2"])
    return h2 @ h2.T


def make_params(key, embed_dim, edge_dim):
    ks = jax.random.split(key, 9)

    def init(k, shape, fan_in):
        return (jax.random.normal(k, shape, jnp.float32) / jnp.sqrt(fan_in)).astype(jnp.float32)

    return {
        "emb_table": init(ks[0], (NUM_EMBEDDINGS, embed_dim), 1.0),
        # GINEConv1: edge Linear(edge_dim -> embed_dim), node nn Linear(embed_dim -> 64)
        "we1": init(ks[1], (edge_dim, embed_dim), edge_dim),
        "be1": init(ks[2], (1, embed_dim), edge_dim),
        "w1":  init(ks[3], (embed_dim, HID1), embed_dim),
        "b1":  init(ks[4], (1, HID1), embed_dim),
        # GINEConv6: edge Linear(edge_dim -> 64), node nn Linear(64 -> 32)
        "we2": init(ks[5], (edge_dim, HID1), edge_dim),
        "be2": init(ks[6], (1, HID1), edge_dim),
        "w2":  init(ks[7], (HID1, HID2), float(HID1)),
        "b2":  init(ks[8], (1, HID2), float(HID1)),
    }


if __name__ == "__main__":
    embed_dim, edge_dim = 32, 16
    n_nodes, n_edges, batch = 16, 32, 2

    key = jax.random.PRNGKey(0)
    k_idx, k_src, k_dst, k_ea, k_par = jax.random.split(key, 5)

    x_idx = jax.random.randint(k_idx, (batch, n_nodes, 1), 0, NUM_EMBEDDINGS, dtype=jnp.int32)
    edge_index = jnp.stack([
        jax.random.randint(k_src, (batch, n_edges), 0, n_nodes, dtype=jnp.int32),
        jax.random.randint(k_dst, (batch, n_edges), 0, n_nodes, dtype=jnp.int32),
    ], axis=1)                                                       # [B, 2, E]
    edge_attr = jax.random.normal(k_ea, (batch, n_edges, edge_dim), jnp.float32)

    params = make_params(k_par, embed_dim, edge_dim)
    param_slab, lay = pack_params(params, embed_dim, edge_dim)       # parameter-prep (once)

    out = latency_model_forward(x_idx, edge_index, edge_attr, param_slab, lay)
    jax.block_until_ready(out)

    ref = jax.vmap(lambda xi, ei, ea: _reference_forward(xi, ei, ea, params))(
        x_idx, edge_index, edge_attr)
    assert out.shape == (batch, n_nodes, n_nodes)
    assert jnp.allclose(out, ref, atol=1e-4, rtol=1e-4), "Pallas kernel mismatch vs JAX reference"

    print("KERNEL_OK")
</pallas_src>

<mosaic_0001>
module attributes {stable_mosaic.version = 11 : i64} {
  func.func @_latency_kernel(%arg0: i32, %arg1: memref<1x40x32xi32, #tpu.memory_space<vmem>>, %arg2: memref<1x32x16xf32, #tpu.memory_space<vmem>>, %arg3: memref<152x128xf32, #tpu.memory_space<vmem>>, %arg4: memref<1x16x128xf32, #tpu.memory_space<vmem>>) attributes {dimension_semantics = [#tpu.dimension_semantics<parallel>], iteration_bounds = array<i64: 2>, scalar_prefetch = 0 : i64, scratch_operands = 0 : i64, tpu.core_type = #tpu.core_type<tc>, window_params = [{transform_indices = @transform_0, window_bounds = array<i64: 1, 40, 32>}, {transform_indices = @transform_1, window_bounds = array<i64: 1, 32, 16>}, {pipeline_mode = #tpu.pipeline_mode<synchronous>, transform_indices = @transform_2, window_bounds = array<i64: 152, 128>}, {transform_indices = @transform_3, window_bounds = array<i64: 1, 16, 128>}]} {
    %c0 = arith.constant 0 : index
    %c0_0 = arith.constant 0 : index
    %c0_1 = arith.constant 0 : index
    %0 = vector.load %arg1[%c0, %c0_0, %c0_1] : memref<1x40x32xi32, #tpu.memory_space<vmem>>, vector<1x40x32xi32>
    %1 = vector.shape_cast %0 : vector<1x40x32xi32> to vector<40x32xi32>
    %c0_2 = arith.constant 0 : index
    %c0_3 = arith.constant 0 : index
    %c0_4 = arith.constant 0 : index
    %2 = vector.load %arg2[%c0_2, %c0_3, %c0_4] : memref<1x32x16xf32, #tpu.memory_space<vmem>>, vector<1x32x16xf32>
    %3 = vector.shape_cast %2 : vector<1x32x16xf32> to vector<32x16xf32>
    %4 = vector.extract_strided_slice %1 {offsets = [0, 0], sizes = [32, 1], strides = [1, 1]} : vector<40x32xi32> to vector<32x1xi32>
    %5 = vector.extract_strided_slice %1 {offsets = [0, 1], sizes = [16, 1], strides = [1, 1]} : vector<40x32xi32> to vector<16x1xi32>
    %6 = vector.extract_strided_slice %1 {offsets = [32, 0], sizes = [1, 32], strides = [1, 1]} : vector<40x32xi32> to vector<1x32xi32>
    %7 = tpu.iota {dimensions = array<i32: 1>} : vector<16x20xi32>
    %8 = vector.broadcast %5 : vector<16x1xi32> to vector<16x20xi32>
    %9 = arith.cmpi eq, %7, %8 : vector<16x20xi32>
    %10 = arith.extui %9 : vector<16x20xi1> to vector<16x20xi32>
    %11 = arith.sitofp %10 : vector<16x20xi32> to vector<16x20xf32>
    %12 = tpu.iota {dimensions = array<i32: 1>} : vector<32x16xi32>
    %13 = vector.broadcast %4 : vector<32x1xi32> to vector<32x16xi32>
    %14 = arith.cmpi eq, %12, %13 : vector<32x16xi32>
    %15 = arith.extui %14 : vector<32x16xi1> to vector<32x16xi32>
    %16 = arith.sitofp %15 : vector<32x16xi32> to vector<32x16xf32>
    %17 = tpu.iota {dimensions = array<i32: 0>} : vector<16x32xi32>
    %18 = vector.broadcast %6 : vector<1x32xi32> to vector<16x32xi32>
    %19 = arith.cmpi eq, %17, %18 : vector<16x32xi32>
    %20 = arith.extui %19 : vector<16x32xi1> to vector<16x32xi32>
    %21 = arith.sitofp %20 : vector<16x32xi32> to vector<16x32xf32>
    %cst = arith.constant 0.000000e+00 : f32
    %22 = vector.broadcast %cst : f32 to vector<16x20xf32>
    %23 = tpu.concatenate %11, %22 in 1 : vector<16x20xf32>, vector<16x20xf32> -> vector<16x40xf32>
    %24 = tpu.iota {dimensions = array<i32: 1>} : vector<32x4xi32>
    %c0_i32 = arith.constant 0 : i32
    %25 = vector.broadcast %c0_i32 : i32 to vector<32x4xi32>
    %26 = arith.cmpi eq, %24, %25 : vector<32x4xi32>
    %27 = arith.extui %26 : vector<32x4xi1> to vector<32x4xi32>
    %28 = arith.sitofp %27 : vector<32x4xi32> to vector<32x4xf32>
    %cst_5 = arith.constant 0.000000e+00 : f32
    %29 = vector.broadcast %cst_5 : f32 to vector<32x20xf32>
    %30 = tpu.concatenate %29, %3, %28 in 1 : vector<32x20xf32>, vector<32x16xf32>, vector<32x4xf32> -> vector<32x40xf32>
    %31 = tpu.concatenate %23, %30 in 0 : vector<16x40xf32>, vector<32x40xf32> -> vector<48x40xf32>
    %c0_6 = arith.constant 0 : index
    %c0_7 = arith.constant 0 : index
    %32 = vector.load %arg3[%c0_6, %c0_7] : memref<152x128xf32, #tpu.memory_space<vmem>>, vector<40x128xf32>
    %cst_8 = arith.constant dense<0.000000e+00> : vector<48x128xf32>
    %33 = tpu.matmul %31, %32, %cst_8 {dimension_numbers = #tpu.dot_dimension_numbers<[1], [0], [0], [1], [0, 0, 1, 1], [], []>} : vector<48x40xf32>, vector<40x128xf32>, vector<48x128xf32> -> vector<48x128xf32>
    %34 = vector.extract_strided_slice %33 {offsets = [0, 0], sizes = [16, 32], strides = [1, 1]} : vector<48x128xf32> to vector<16x32xf32>
    %35 = vector.extract_strided_slice %33 {offsets = [16, 0], sizes = [32, 128], strides = [1, 1]} : vector<48x128xf32> to vector<32x128xf32>
    %36 = vector.extract_strided_slice %35 {offsets = [0, 32], sizes = [32, 32], strides = [1, 1]} : vector<32x128xf32> to vector<32x32xf32>
    %37 = vector.extract_strided_slice %35 {offsets = [0, 64], sizes = [32, 64], strides = [1, 1]} : vector<32x128xf32> to vector<32x64xf32>
    %c40 = arith.constant 40 : index
    %c0_9 = arith.constant 0 : index
    %38 = vector.load %arg3[%c40, %c0_9] : memref<152x128xf32, #tpu.memory_space<vmem>>, vector<32x64xf32>
    %c72 = arith.constant 72 : index
    %c0_10 = arith.constant 0 : index
    %39 = vector.load %arg3[%c72, %c0_10] : memref<152x128xf32, #tpu.memory_space<vmem>>, vector<1x64xf32>
    %cst_11 = arith.constant dense<0.000000e+00> : vector<32x32xf32>
    %40 = tpu.matmul %16, %34, %cst_11 {dimension_numbers = #tpu.dot_dimension_numbers<[1], [0], [0], [1], [0, 0, 1, 1], [], []>} : vector<32x16xf32>, vector<16x32xf32>, vector<32x32xf32> -> vector<32x32xf32>
    %41 = arith.addf %40, %36 : vector<32x32xf32>
    %cst_12 = arith.constant 0.000000e+00 : f32
    %42 = vector.broadcast %cst_12 : f32 to vector<32x32xf32>
    %43 = arith.maximumf %41, %42 : vector<32x32xf32>
    %cst_13 = arith.constant dense<0.000000e+00> : vector<16x32xf32>
    %44 = tpu.matmul %21, %43, %cst_13 {dimension_numbers = #tpu.dot_dimension_numbers<[1], [0], [0], [1], [0, 0, 1, 1], [], []>} : vector<16x32xf32>, vector<32x32xf32>, vector<16x32xf32> -> vector<16x32xf32>
    %cst_14 = arith.constant 1.000000e+00 : f32
    %45 = vector.broadcast %cst_14 : f32 to vector<16x32xf32>
    %46 = arith.mulf %45, %34 : vector<16x32xf32>
    %47 = arith.addf %44, %46 : vector<16x32xf32>
    %cst_15 = arith.constant dense<0.000000e+00> : vector<16x64xf32>
    %48 = tpu.matmul %47, %38, %cst_15 {dimension_numbers = #tpu.dot_dimension_numbers<[1], [0], [0], [1], [0, 0, 1, 1], [], []>} : vector<16x32xf32>, vector<32x64xf32>, vector<16x64xf32> -> vector<16x64xf32>
    %49 = vector.broadcast %39 : vector<1x64xf32> to vector<16x64xf32>
    %50 = arith.addf %48, %49 : vector<16x64xf32>
    %cst_16 = arith.constant 0.000000e+00 : f32
    %51 = vector.broadcast %cst_16 : f32 to vector<16x64xf32>
    %52 = arith.cmpf ogt, %50, %51 : vector<16x64xf32>
    %cst_17 = arith.constant 0.00999999977 : f32
    %53 = vector.broadcast %cst_17 : f32 to vector<16x64xf32>
    %54 = arith.mulf %53, %50 : vector<16x64xf32>
    %55 = arith.select %52, %50, %54 : vector<16x64xi1>, vector<16x64xf32>
    %c80 = arith.constant 80 : index
    %c0_18 = arith.constant 0 : index
    %56 = vector.load %arg3[%c80, %c0_18] : memref<152x128xf32, #tpu.memory_space<vmem>>, vector<64x32xf32>
    %c144 = arith.constant 144 : index
    %c0_19 = arith.constant 0 : index
    %57 = vector.load %arg3[%c144, %c0_19] : memref<152x128xf32, #tpu.memory_space<vmem>>, vector<1x32xf32>
    %cst_20 = arith.constant dense<0.000000e+00> : vector<32x64xf32>
    %58 = tpu.matmul %16, %55, %cst_20 {dimension_numbers = #tpu.dot_dimension_numbers<[1], [0], [0], [1], [0, 0, 1, 1], [], []>} : vector<32x16xf32>, vector<16x64xf32>, vector<32x64xf32> -> vector<32x64xf32>
    %59 = arith.addf %58, %37 : vector<32x64xf32>
    %cst_21 = arith.constant 0.000000e+00 : f32
    %60 = vector.broadcast %cst_21 : f32 to vector<32x64xf32>
    %61 = arith.maximumf %59, %60 : vector<32x64xf32>
    %cst_22 = arith.constant dense<0.000000e+00> : vector<16x64xf32>
    %62 = tpu.matmul %21, %61, %cst_22 {dimension_numbers = #tpu.dot_dimension_numbers<[1], [0], [0], [1], [0, 0, 1, 1], [], []>} : vector<16x32xf32>, vector<32x64xf32>, vector<16x64xf32> -> vector<16x64xf32>
    %cst_23 = arith.constant 1.000000e+00 : f32
    %63 = vector.broadcast %cst_23 : f32 to vector<16x64xf32>
    %64 = arith.mulf %63, %55 : vector<16x64xf32>
    %65 = arith.addf %62, %64 : vector<16x64xf32>
    %cst_24 = arith.constant dense<0.000000e+00> : vector<16x32xf32>
    %66 = tpu.matmul %65, %56, %cst_24 {dimension_numbers = #tpu.dot_dimension_numbers<[1], [0], [0], [1], [0, 0, 1, 1], [], []>} : vector<16x64xf32>, vector<64x32xf32>, vector<16x32xf32> -> vector<16x32xf32>
    %67 = vector.broadcast %57 : vector<1x32xf32> to vector<16x32xf32>
    %68 = arith.addf %66, %67 : vector<16x32xf32>
    %cst_25 = arith.constant dense<0.000000e+00> : vector<16x16xf32>
    %69 = tpu.matmul %68, %68, %cst_25 {dimension_numbers = #tpu.dot_dimension_numbers<[1], [1], [0], [0], [0, 0, 1, 0], [], []>} : vector<16x32xf32>, vector<16x32xf32>, vector<16x16xf32> -> vector<16x16xf32>
    %cst_26 = arith.constant 0.000000e+00 : f32
    %70 = vector.broadcast %cst_26 : f32 to vector<16x112xf32>
    %71 = tpu.concatenate %69, %70 in 1 : vector<16x16xf32>, vector<16x112xf32> -> vector<16x128xf32>
    %c0_27 = arith.constant 0 : index
    %c0_28 = arith.constant 0 : index
    %c0_29 = arith.constant 0 : index
    %72 = vector.load %arg4[%c0_27, %c0_28, %c0_29] : memref<1x16x128xf32, #tpu.memory_space<vmem>>, vector<1x16x128xf32>
    %73 = vector.shape_cast %72 : vector<1x16x128xf32> to vector<16x128xf32>
    %74 = vector.shape_cast %71 : vector<16x128xf32> to vector<1x16x128xf32>
    tpu.vector_store %arg4[%c0_27, %c0_28, %c0_29], %74 {strides = array<i32>} : memref<1x16x128xf32, #tpu.memory_space<vmem>>, vector<1x16x128xf32>,
    return
  }
  func.func @transform_0(%arg0: i32) -> (i32, i32, i32) {
    %c0_i32 = arith.constant 0 : i32
    %c0_i32_0 = arith.constant 0 : i32
    %c0_i32_1 = arith.constant 0 : i32
    return %arg0, %c0_i32, %c0_i32_0 : i32, i32, i32
  }
  func.func @transform_1(%arg0: i32) -> (i32, i32, i32) {
    %c0_i32 = arith.constant 0 : i32
    %c0_i32_0 = arith.constant 0 : i32
    %c0_i32_1 = arith.constant 0 : i32
    return %arg0, %c0_i32, %c0_i32_0 : i32, i32, i32
  }
  func.func @transform_2(%arg0: i32) -> (i32, i32) {
    %c0_i32 = arith.constant 0 : i32
    %c0_i32_0 = arith.constant 0 : i32
    %c0_i32_1 = arith.constant 0 : i32
    return %c0_i32, %c0_i32_0 : i32, i32
  }
  func.func @transform_3(%arg0: i32) -> (i32, i32, i32) {
    %c0_i32 = arith.constant 0 : i32
    %c0_i32_0 = arith.constant 0 : i32
    %c0_i32_1 = arith.constant 0 : i32
    return %arg0, %c0_i32, %c0_i32_0 : i32, i32, i32
  }
}

</mosaic_0001>

<bundles_post_ra>
// kernel: tpu_custom_call.1
= control target key start
LH: loop header
LB: loop body
LE: loop exit
PB: predicated region body
PF: predicated region fallthrough
CT: control target
= control target key end

     0   :  { %8 = vsyncpa [#allocation3], 0  ;;  %s1747_s0 = inlined_call_operand.vmem [shape: s32[2,40,32], index: 0, kind: input, shape index: {}]   ;;  %s1748_s1 = inlined_call_operand.vmem [shape: f32[2,32,16], index: 1, kind: input, shape index: {}]   ;;  %s1749_s2 = inlined_call_operand.vmem [shape: f32[152,128], index: 2, kind: input, shape index: {}]   ;;  %s1750_s3 = inlined_call_operand.hbm [shape: f32[2,16,128], index: 3, kind: output, shape index: {}]  }
   0x1   :  { %10 = vsyncpa [#allocation3 + $0x1], 0  ;;  %s1492_s12 = smov 0   ;;  %s1494_s13 = smov 0  }
   0x2   :  { %s1496_s14 = smov 0   ;;  %s1498_s15 = smov 0  }
   0x3 LB: > { %s1513_s16 = sadd.s32 4294967295, %s1460_s15   ;;  %s1143_s17 = sadd.s32 4294967294, %s1460_s15   ;;  %s1460_s15 = sphi %s1498_s15, %s1756_s15   ;;  %s1456_s14 = sphi %s1496_s14, %s1755_s14   ;;  %s1452_s13 = sphi %s1494_s13, %s1754_s13   ;;  %s1448_s12 = sphi %s1492_s12, %s1753_s12  }
   0x4   : > { %s1517_s18 = sadd.s32 1, %s1460_s15   ;;  %s96_s19 = sadd.s32 1, %s1456_s14 }
   0x5   : > { %s93_s20 = ssub.s32 %s1460_s15, %s1517_s18  ;;  %p106_p0 = scmp.ne.s32.totalorder %s1456_s14, %s1452_s13 }
   0x6   : > { %p94_p1 = scmp.eq.s32.totalorder %s93_s20, 0  ;;  %p107_p2 = scmp.eq.s32.totalorder %s1513_s16, 1 }
   0x7   : > { %p112_p3 = scmp.ne.s32.totalorder %s1452_s13, %s1448_s12  ;;  %p113_p4 = scmp.eq.s32.totalorder %s1143_s17, 1 }
   0x8   : > { %s1528_s21 = scalar_select %p94_p1, %s1456_s14, %s96_s19  }
   0x9   : > { %p1530_p5 = por %p107_p2, %p106_p0  ;;  %p1534_p6 = por %p113_p4, %p112_p3 }
   0xa   : > { %p1146_p7 = scmp.ge.s32.totalorder %s1460_s15, 1  ;;  %p150_p8 = scmp.lt.s32.totalorder %s1460_s15, 3 }
   0xc   : > { %p151_p9 = pnand %p1146_p7, %p150_p8 }
   0xd   : > { %p179_p10 = scmp.lt.s32.totalorder (!%p151_p9), %s1513_s16, 1  ;;  %s1463_s20 = smov (!%p151_p9), 20  }
   0xe   : > { %154 = sbr.rel (%p151_p9) target bundleno = 1782 (0x6f6), region = 32  ;;  %s1466_s26 = smov (!%p151_p9), 36  }
   0xf   : > { %s1467_s27 = smov (!%p151_p9), 96   ;;  %s176_s17 = sand.u32 (!%p151_p9), 1, %s1452_s13  }
  0x10   : > { %s1194_s25 = sshll.u32 (!%p151_p9), %s1513_s16, 8 }
  0x13   : > { %v288_v0 = vld [vmem:[%s1749_s2 + $0x20] sm:$0xff]  ;;  %v287_v1 = vld [vmem:[%s1749_s2 + $0x18] sm:$0xff]  ;;  %v1462_v2 = vmov 1   ;;  %s180_s28 = scalar_select %p179_p10, %s1513_s16, 1  ;;  %v198_v3 = vlaneseq  ;;  %v286_v4 = vld [vmem:[%s1749_s2 + $0x10] sm:$0xff]  ;;  %v1464_v13 = vmov 0  }
  0x14   : > { %1397 = vset.pattern.permute.xlu0 %v1462_v2  ;;  %1250 = vmatprep.subr.mxu0 %v288_v0  ;;  %v285_v5 = vld [vmem:[%s1749_s2 + $0x8] sm:$0xff]  ;;  %v284_v10 = vld [vmem:[%s1749_s2] sm:$0xff]  ;;  %v1465_v14 = vmov 0.0   ;;  %vm249_vm1 = vcmask 162816   ;;  %vm289_vm3 = vcmask 326656   ;;  %vm279_vm5 = vcmask 293888  }
  0x15   : > { %1251 = vmatpush3.msra.mxu0 %v288_v0  ;;  %s1348_s29 = smul.u32 40, %s180_s28  ;;  %s1193_s30 = sshll.u32 %s180_s28, 5  ;;  %v1563_v7 = vand.u32 127, %v198_v3  ;;  %1398 = vset.pattern.permute.xlu1 %v1464_v13  ;;  %vm424_vm7 = vcmask 130048   ;;  %v237_v52 = vshrl.u32 %v198_v3, 7  ;;  %vm526_vm13 = vcmask 261120  }
  0x16   : > { %1252 = vmatprep.subr.mxu0 %v287_v1  ;;  %s188_s10 = scalar_lea.vmem %s1748_s1, %s1193_s30  ;;  %s1468_s28 = smov 64  }
  0x17   : > { %1253 = vmatpush3.msra.mxu0 %v287_v1  ;;  %s1560_s19 = scalar_lea.vmem %s1747_s0, %s1348_s29  ;;  %v194_v6 = vld [vmem:[%s188_s10] sm:$0xff]  ;;  %v195_v9 = vld [vmem:[%s188_s10 + $0x8] sm:$0xff]  ;;  %vm252_vm0 = vcmp.eq.s32.totalorder %v1563_v7, 0  ;;  %v196_v12 = vld [vmem:[%s188_s10 + $0x10] sm:$0xff]  ;;  %v241_v53 = vsub.s32 0, %v237_v52  ;;  %v238_v56 = vadd.s32 8, %v237_v52 }
  0x18   : > { %1254 = vmatprep.subr.mxu0 %v286_v4  ;;  %v189_v8 = vld [vmem:[%s1560_s19] sm:$0xff]  ;;  %259 = vrot.lane.b32.xlu1 %v194_v6, %s1463_s20  ;;  %v190_v11 = vld [vmem:[%s1560_s19 + $0x8] sm:$0xff]  ;;  %v1159_v15 = vsel %vm252_vm0, 1.0, %v1465_v14  ;;  %v197_v16 = vld [vmem:[%s188_s10 + $0x18] sm:$0xff]  ;;  %vm888_vm0 = vcmask 523264   ;;  %s1707_s29 = scalar_lea.sflag [#allocation3], %s176_s17 }
  0x19   : > { %1255 = vmatpush3.msra.mxu0 %v286_v4  ;;  %201 = vperm.xlu0 %1397, %v189_v8   ;;  %v191_v17 = vld [vmem:[%s1560_s19 + $0x10] sm:$0xff]  ;;  %v192_v18 = vld [vmem:[%s1560_s19 + $0x18] sm:$0xff]  ;;  %v193_v54 = vld [vmem:[%s1560_s19 + $0x20] sm:$0xff]  ;;  %s1147_s19 = sshll.u32 %s176_s17, 4  ;;  %s1469_s30 = smov [#allocation2]  }
  0x1a   : > { %1256 = vmatprep.subr.mxu0 %v285_v5  ;;  %v242_v55 = vrot.slane %v193_v54, %v241_v53  ;;  %s1404_s4 = sshll.u32 %s1469_s30, 4  ;;  %s1405_s4 = int_to_ptr.vmem [resolvable:$false] %s1404_s4 }
  0x1b   : > { %1257 = vmatpush3.msra.mxu0 %v285_v5  ;;  %s1406_s5 = scalar_lea.vmem %s1405_s4, 512 }
  0x1c   : > { %1258 = vmatprep.subr.mxu0 %v284_v10  ;;  %261 = vrot.lane.b32.xlu1 %v195_v9, %s1463_s20  ;;  %vm243_vm11 = vcmp.eq.s32.totalorder %v237_v52, %v242_v55  ;;  %vm244_vm12 = vcmp.eq.s32.totalorder %v238_v56, %v242_v55  ;;  %v1181_v56 = vld [vmem:[%s1749_s2 + $0x90] ss:$0 sm:$0xff] }
  0x1d   : > { %1259 = vmatpush3.msra.mxu0 %v284_v10  ;;  %204 = vperm.xlu0 %1397, %v190_v11   ;;  %v1157_v57 = vsel %vm243_vm11, 1.0, %v1465_v14  ;;  %v1626_v10 = vsel %vm244_vm12, 1.0, %v1465_v14 }
  0x20   : > { %263 = vrot.lane.b32.xlu1 %v196_v12, %s1463_s20  ;;  %v405_v12 = vld [vmem:[%s1749_s2 + $0x38] sm:$0xff] }
  0x21   : > { %272 = vrot.lane.b32.xlu0 %v1159_v15, %s1466_s26 }
  0x22   : > { %1399 = vset.pattern.permute.xlu0 %v1464_v13  ;;  %v404_v13 = vld [vmem:[%s1749_s2 + $0x30] sm:$0xff] }
  0x24   : > { %213 = vperm.xlu1 %1398, %v189_v8  }
  0x25   : > { %265 = vrot.lane.b32.xlu0 %v197_v16, %s1463_s20  ;;  %s178_s20 = scalar_lea.vmem [#allocation2], %s1147_s19 }
  0x26   : > { %s1069_s24 = sshll.u32 %s178_s20, 4  ;;  %s1699_s24 = int_to_ptr.vmem [resolvable:$true] %s1069_s24 }
  0x27   : > { %s1400_s16 = scalar_lea.vmem %s1699_s24, 256  ;;  %p1407_p0 = scmp.lt.s32.totalorder %s1699_s24, %s1405_s4 }
  0x28   : > { %219 = vperm.xlu1 %1398, %v191_v17   ;;  %p1401_p11 = scmp.ne.s32.totalorder %s1699_s24, %s1400_s16  ;;  %p1408_p1 = scmp.lt.s32.totalorder %s1406_s5, %s1400_s16 }
  0x29   : > { %216 = vperm.xlu0 %1399, %v190_v11   ;;  %v406_v11 = vld [vmem:[%s1749_s2 + $0x40] sm:$0xff] }
  0x2a   : > { %p1402_p12 = pnand %p1401_p11, %p1530_p5  ;;  %p1409_p2 = por %p1408_p1, %p1407_p0 }
  0x2c   : > { %222 = vperm.xlu1 %1398, %v192_v18   ;;  %p1403_p13 = pneg %p1402_p12 }
  0x2e   : > { %p1410_p3 = pnand %p1409_p2, %p1403_p13 }
  0x8a   : > { %v260_v19 = vpop.permute.xlu1 %259 }
  0x8b   : > { %v275_v27 = vsel %vm249_vm1, 0.0, %v260_v19  ;;  %v1172_v19 = vld [vmem:[%s1749_s2 + $0x48] ss:$0 sm:$0xff] }
  0x8e   : > { %v262_v20 = vpop.permute.xlu1 %261 }
  0x8f   : > { %v276_v28 = vsel %vm249_vm1, 0.0, %v262_v20 }
  0x92   : > { %v264_v25 = vpop.permute.xlu1 %263 }
  0x93   : > { %v277_v30 = vsel %vm249_vm1, 0.0, %v264_v25 }
  0x94   : > { %v202_v21 = vpop.permute.xlu0 %201 }
  0x95   : > { %vm206_vm2 = vcmp.eq.s32.totalorder %v1563_v7, %v202_v21 }
  0x96   : > { %v1151_v22 = vsel %vm206_vm2, 1.0, %v1465_v14 }
  0x97   : > { %v250_v23 = vsel %vm249_vm1, %v1151_v22, 0.0 }
  0x98   : > { %1260 = vmatprep.mubr.msk.f32.mxu0 %vm289_vm3, %v250_v23  ;;  %v205_v24 = vpop.permute.xlu0 %204 }
  0x99   : > { %vm207_vm4 = vcmp.eq.s32.totalorder %v1563_v7, %v205_v24 }
  0x9a   : > { %v1152_v26 = vsel %vm207_vm4, 1.0, %v1465_v14 }
  0x9b   : > { %v251_v29 = vsel %vm249_vm1, %v1152_v26, 0.0 }
  0x9c   : > { %1261 = vmatmul.mubr.msk.f32.vlgmr.msra.gmra.mxu0 %vm289_vm3, %v251_v29  ;;  %v273_v31 = vpop.permute.xlu0 %272  ;;  %v705_v29 = vld [vmem:[%s1749_s2 + $0x80] sm:$0xff] }
  0x9d   : > { %v280_v32 = vsel %vm279_vm5, %v275_v27, %v273_v31  ;;  %v281_v33 = vsel %vm279_vm5, %v276_v28, %v273_v31  ;;  %v282_v34 = vsel %vm279_vm5, %v277_v30, %v273_v31  ;;  %v706_v28 = vld [vmem:[%s1749_s2 + $0x88] sm:$0xff]  ;;  %v704_v30 = vld [vmem:[%s1749_s2 + $0x78] sm:$0xff] }
  0x9e   : > { %1263 = vmatprep.mubr.msk.f32.mxu0 %vm289_vm3, %v280_v32  ;;  %v702_v32 = vld [vmem:[%s1749_s2 + $0x68] sm:$0xff] }
  0x9f   : > { %v214_v38 = vpop.permute.xlu1 %213 }
  0xa0   : > { %1264 = vmatmul.mubr.msk.f32.gmra.mxu0 %vm289_vm3, %v281_v33  ;;  %v266_v35 = vpop.permute.xlu0 %265  ;;  %vm224_vm6 = vcmp.eq.s32.totalorder %v1563_v7, %v214_v38 }
  0xa1   : > { %v278_v36 = vsel %vm249_vm1, 0.0, %v266_v35  ;;  %1266 = vmatprep.mubr.msk.f32.mxu0 %vm289_vm3, %v282_v34  ;;  %v1153_v39 = vsel %vm224_vm6, 1.0, %v1465_v14 }
  0xa2   : > { %v283_v37 = vsel %vm279_vm5, %v278_v36, %v273_v31  ;;  %1273 = vmatprep.mubr.msk.f32.mxu1 %vm424_vm7, %v1153_v39  ;;  %v703_v31 = vld [vmem:[%s1749_s2 + $0x70] sm:$0xff] }
  0xa3   : > { %v220_v40 = vpop.permute.xlu1 %219 }
  0xa4   : > { %1267 = vmatmul.mubr.msk.f32.gmra.mxu0 %vm289_vm3, %v283_v37  ;;  %v217_v41 = vpop.permute.xlu0 %216  ;;  %vm226_vm9 = vcmp.eq.s32.totalorder %v1563_v7, %v220_v40 }
  0xa5   : > { %1305 = vmatprep.mubr.msk.f32.mxu0 %vm424_vm7, %v1153_v39  ;;  %vm225_vm8 = vcmp.eq.s32.totalorder %v1563_v7, %v217_v41  ;;  %v1608_v47 = vsel %vm226_vm9, 1.0, %v1465_v14 }
  0xa6   : > { %v1603_v45 = vsel %vm225_vm8, 1.0, %v1465_v14 }
  0xa7   : > { %v223_v43 = vpop.permute.xlu1 %222 }
  0xa8   : > { %vm227_vm10 = vcmp.eq.s32.totalorder %v1563_v7, %v223_v43 }
  0xa9   : > { %v1616_v49 = vsel %vm227_vm10, 1.0, %v1465_v14  ;;  %v403_v14 = vld [vmem:[%s1749_s2 + $0x28] sm:$0xff] }
 0x15c   : > { %v1595_v42 = vpop.f32.mrf.mxu0 }
 0x15d   : > { %1269 = vmatprep.subr.mxu1 %v1595_v42 }
 0x15e   : > { %v1599_v44 = vpop.f32.mrf.mxu0  ;;  %1270 = vmatpush3.msra.mxu1 %v1595_v42 }
 0x15f   : > { %1271 = vmatprep.subr.mxu1 %v1599_v44 }
 0x160   : > { %1272 = vmatpush3.msra.mxu1 %v1599_v44  ;;  %v1265_v46 = vpop.f32.mrf.mxu0 }
 0x161   : > { %1274 = vmatmul.mubr.msk.f32.vlgmr.msra.gmra.mxu1 %vm424_vm7, %v1603_v45 }
 0x162   : > { %1276 = vmatprep.mubr.msk.f32.mxu1 %vm424_vm7, %v1608_v47  ;;  %v384_v48 = vpop.f32.mrf.mxu0 }
 0x164   : > { %v1268_v50 = vpop.f32.mrf.mxu0 }
 0x165   : > { %1277 = vmatmul.mubr.msk.f32.gmra.mxu1 %vm424_vm7, %v1616_v49  ;;  %418 = vrot.lane.b32.xlu0 %v1268_v50, %s1467_s27 }
 0x166   : > { %v394_v51 = vpop.f32.mrf.mxu0  ;;  %1287 = vmatprep.mubr.msk.f32.mxu1 %vm526_vm13, %v1157_v57 }
 0x167   : > { %416 = vrot.lane.b32.xlu1 %v394_v51, %s1467_s27 }
 0x169   : > { %414 = vrot.lane.b32.xlu0 %v1265_v46, %s1467_s27 }
 0x16b   : > { %412 = vrot.lane.b32.xlu1 %v384_v48, %s1467_s27 }
 0x16d   : > { %714 = vrot.lane.b32.xlu0 %v1268_v50, %s1468_s28  ;;  %v700_v50 = vld [vmem:[%s1749_s2 + $0x58] sm:$0xff] }
 0x16f   : > { %712 = vrot.lane.b32.xlu1 %v394_v51, %s1468_s28  ;;  %v699_v51 = vld [vmem:[%s1749_s2 + $0x50] sm:$0xff] }
 0x171   : > { %710 = vrot.lane.b32.xlu0 %v1265_v46, %s1468_s28 }
 0x173   : > { %708 = vrot.lane.b32.xlu1 %v384_v48, %s1468_s28  ;;  %s1704_s28 = scalar_lea.hbm %s1750_s3, %s1194_s25 }
 0x1d7   : > { %v419_v58 = vpop.permute.xlu0 %418 }
 0x1d9   : > { %v417_v60 = vpop.permute.xlu1 %416 }
 0x1db   : > { %v415_v0 = vpop.permute.xlu0 %414 }
 0x1dd   : > { %v413_v5 = vpop.permute.xlu1 %412 }
 0x1df   : > { %v715_v33 = vpop.permute.xlu0 %714 }
 0x1e1   : > { %v713_v35 = vpop.permute.xlu1 %712 }
 0x1e3   : > { %v711_v39 = vpop.permute.xlu0 %710 }
 0x221   : > { %v1275_v59 = vpop.f32.mrf.mxu1 }
 0x222   : > { %v509_v2 = vadd.f32 %v1275_v59, %v415_v0 }
 0x223   : > { %v503_v61 = vpop.f32.mrf.mxu1 }
 0x224   : > { %v504_v6 = vadd.f32 %v503_v61, %v413_v5  ;;  %v523_v8 = vmax.f32 %v509_v2, 0.0 }
 0x225   : > { %v1278_v62 = vpop.f32.mrf.mxu1 }
 0x226   : > { %v519_v63 = vadd.f32 %v1278_v62, %v419_v58  ;;  %v522_v9 = vmax.f32 %v504_v6, 0.0 }
 0x227   : > { %v513_v1 = vpop.f32.mrf.mxu1 }
 0x228   : > { %v525_v3 = vmax.f32 %v519_v63, 0.0  ;;  %v514_v4 = vadd.f32 %v513_v1, %v417_v60 }
 0x22a   : > { %v524_v7 = vmax.f32 %v514_v4, 0.0  ;;  %1279 = vmatprep.subr.mxu1 %v525_v3 }
 0x22b   : > { %1280 = vmatpush3.msra.mxu1 %v525_v3 }
 0x22c   : > { %1281 = vmatprep.subr.mxu1 %v524_v7 }
 0x22d   : > { %1282 = vmatpush3.msra.mxu1 %v524_v7 }
 0x22e   : > { %1283 = vmatprep.subr.mxu1 %v523_v8 }
 0x22f   : > { %1284 = vmatpush3.msra.mxu1 %v523_v8 }
 0x230   : > { %1285 = vmatprep.subr.mxu1 %v522_v9 }
 0x231   : > { %1286 = vmatpush3.msra.mxu1 %v522_v9 }
 0x232   : > { %1288 = vmatmul.mubr.msk.f32.vlgmr.msra.gmra.mxu1 %vm526_vm13, %v1626_v10  ;;  %1290 = vmatprep.subr.mxu1 %v406_v11 }
 0x233   : > { %1291 = vmatpush3.msra.mxu1 %v406_v11 }
 0x234   : > { %1292 = vmatprep.subr.mxu1 %v405_v12 }
 0x235   : > { %1293 = vmatpush3.msra.mxu1 %v405_v12 }
 0x236   : > { %1294 = vmatprep.subr.mxu1 %v404_v13 }
 0x237   : > { %1295 = vmatpush3.msra.mxu1 %v404_v13 }
 0x238   : > { %1296 = vmatprep.subr.mxu1 %v403_v14 }
 0x239   : > { %1297 = vmatpush3.msra.mxu1 %v403_v14 }
 0x2f2   : > { %v1289_v15 = vpop.f32.mrf.mxu1 }
 0x2f3   : > { %v605_v18 = vadd.f32 %v1289_v15, %v1595_v42 }
 0x2f4   : > { %v599_v16 = vpop.f32.mrf.mxu1 }
 0x2f5   : > { %v600_v17 = vadd.f32 %v599_v16, %v1599_v44  ;;  %v709_v44 = vpop.permute.xlu1 %708 }
 0x2f7   : > { %1298 = vmatprep.mubr.msk.f32.mxu1 %vm526_vm13, %v600_v17 }
 0x2f8   : > { %1299 = vmatmul.mubr.msk.f32.vlgmr.msra.gmra.mxu1 %vm526_vm13, %v605_v18 }
 0x2f9   : > { %1319 = vmatprep.mubr.msk.f32.mxu1 %vm526_vm13, %v1157_v57 }
 0x3b8   : > { %v1300_v20 = vpop.f32.mrf.mxu1 }
 0x3b9   : > { %v690_v21 = vadd.f32 %v1300_v20, %v1172_v19 }
 0x3ba   : > { %v684_v22 = vpop.f32.mrf.mxu1 }
 0x3bb   : > { %v696_v23 = vmul.f32 0.01, %v690_v21  ;;  %v685_v24 = vadd.f32 %v1172_v19, %v684_v22  ;;  %vm694_vm14 = vcmp.gt.f32.partialorder %v690_v21, 0.0 }
 0x3bd   : > { %v695_v25 = vmul.f32 0.01, %v685_v24  ;;  %v1650_v26 = vsel %vm694_vm14, %v690_v21, %v696_v23  ;;  %vm693_vm15 = vcmp.gt.f32.partialorder %v685_v24, 0.0 }
 0x3be   : > { %1301 = vmatprep.subr.mxu0 %v1650_v26 }
 0x3bf   : > { %1302 = vmatpush3.msra.mxu0 %v1650_v26  ;;  %v697_v27 = vsel %vm693_vm15, %v685_v24, %v695_v25 }
 0x3c0   : > { %1303 = vmatprep.subr.mxu0 %v697_v27 }
 0x3c1   : > { %1304 = vmatpush3.msra.mxu0 %v697_v27 }
 0x3c2   : > { %1306 = vmatmul.mubr.msk.f32.vlgmr.msra.gmra.mxu0 %vm424_vm7, %v1603_v45  ;;  %1322 = vmatprep.subr.mxu0 %v706_v28 }
 0x3c3   : > { %1308 = vmatprep.mubr.msk.f32.mxu0 %vm424_vm7, %v1608_v47  ;;  %1323 = vmatpush3.msra.mxu0 %v706_v28 }
 0x3c4   : > { %1324 = vmatprep.subr.mxu0 %v705_v29 }
 0x3c5   : > { %1325 = vmatpush3.msra.mxu0 %v705_v29 }
 0x3c6   : > { %1309 = vmatmul.mubr.msk.f32.gmra.mxu0 %vm424_vm7, %v1616_v49  ;;  %1326 = vmatprep.subr.mxu0 %v704_v30  ;;  %v701_v49 = vld [vmem:[%s1749_s2 + $0x60] sm:$0xff] }
 0x3c7   : > { %1327 = vmatpush3.msra.mxu0 %v704_v30 }
 0x3c8   : > { %1328 = vmatprep.subr.mxu0 %v703_v31 }
 0x3c9   : > { %1329 = vmatpush3.msra.mxu0 %v703_v31 }
 0x3ca   : > { %1330 = vmatprep.subr.mxu0 %v702_v32 }
 0x3cb   : > { %1331 = vmatpush3.msra.mxu0 %v702_v32 }
 0x3cc   : > { %1332 = vmatprep.subr.mxu0 %v701_v49 }
 0x3cd   : > { %1333 = vmatpush3.msra.mxu0 %v701_v49 }
 0x3ce   : > { %1334 = vmatprep.subr.mxu0 %v700_v50 }
 0x3cf   : > { %1335 = vmatpush3.msra.mxu0 %v700_v50 }
 0x3d0   : > { %1336 = vmatprep.subr.mxu0 %v699_v51 }
 0x3d1   : > { %1337 = vmatpush3.msra.mxu0 %v699_v51 }
 0x482   : > { %v1307_v34 = vpop.f32.mrf.mxu0 }
 0x483   : > { %v792_v41 = vadd.f32 %v1307_v34, %v711_v39 }
 0x484   : > { %v786_v36 = vpop.f32.mrf.mxu0 }
 0x485   : > { %v787_v45 = vadd.f32 %v786_v36, %v709_v44  ;;  %v806_v47 = vmax.f32 %v792_v41, 0.0 }
 0x486   : > { %v1310_v37 = vpop.f32.mrf.mxu0 }
 0x487   : > { %v802_v38 = vadd.f32 %v1310_v37, %v715_v33  ;;  %v805_v48 = vmax.f32 %v787_v45, 0.0 }
 0x488   : > { %v796_v40 = vpop.f32.mrf.mxu0 }
 0x489   : > { %v808_v42 = vmax.f32 %v802_v38, 0.0  ;;  %v797_v43 = vadd.f32 %v796_v40, %v713_v35 }
 0x48b   : > { %v807_v46 = vmax.f32 %v797_v43, 0.0  ;;  %1311 = vmatprep.subr.mxu1 %v808_v42 }
 0x48c   : > { %1312 = vmatpush3.msra.mxu1 %v808_v42 }
 0x48d   : > { %1313 = vmatprep.subr.mxu1 %v807_v46 }
 0x48e   : > { %1314 = vmatpush3.msra.mxu1 %v807_v46 }
 0x48f   : > { %1315 = vmatprep.subr.mxu1 %v806_v47 }
 0x490   : > { %1316 = vmatpush3.msra.mxu1 %v806_v47 }
 0x491   : > { %1317 = vmatprep.subr.mxu1 %v805_v48 }
 0x492   : > { %1318 = vmatpush3.msra.mxu1 %v805_v48 }
 0x493   : > { %1320 = vmatmul.mubr.msk.f32.vlgmr.msra.gmra.mxu1 %vm526_vm13, %v1626_v10 }
 0x553   : > { %v1321_v52 = vpop.f32.mrf.mxu1 }
 0x554   : > { %v881_v55 = vadd.f32 %v1321_v52, %v1650_v26 }
 0x555   : > { %v875_v53 = vpop.f32.mrf.mxu1 }
 0x556   : > { %v876_v54 = vadd.f32 %v875_v53, %v697_v27 }
 0x558   : > { %1338 = vmatprep.mubr.msk.f32.mxu0 %vm888_vm0, %v876_v54 }
 0x559   : > { %1339 = vmatmul.mubr.msk.f32.vlgmr.msra.gmra.mxu0 %vm888_vm0, %v881_v55 }
 0x619   : > { %v1340_v57 = vpop.f32.mrf.mxu0 }
 0x61a   : > { %v967_v58 = vadd.f32 %v1340_v57, %v1181_v56 }
 0x61b   : > { %v961_v59 = vpop.f32.mrf.mxu0 }
 0x61c   : > { %v962_v60 = vadd.f32 %v1181_v56, %v961_v59  ;;  %1341 = vmatprep.subr.msk.mxu1 %vm526_vm13, %v967_v58 }
 0x61d   : > { %1342 = vmatpush3.xpose.msk.msra.mxu1 %vm526_vm13, %v967_v58 }
 0x61e   : > { %1343 = vmatprep.subr.msk.mxu1 %vm526_vm13, %v962_v60  ;;  %1345 = vmatprep.mubr.msk.f32.mxu1 %vm526_vm13, %v962_v60 }
 0x621   : > { %1344 = vmatpush3.xpose.msk.msra.mxu1 %vm526_vm13, %v962_v60 }
 0x624   : > { %1346 = vmatmul.mubr.msk.f32.vlgmr.msra.gmra.mxu1 %vm526_vm13, %v967_v58 }
 0x6e4   : > { %v1347_v61 = vpop.f32.mrf.mxu1 }
 0x6e5   : > { %v1052_v62 = vsel %vm424_vm7, %v1347_v61, 0.0 }
 0x6e6   : > { %1054 = vst [vmem:[%s178_s20 + $0x8] sm:$0xff] %v1052_v62  ;;  %v1042_v63 = vpop.f32.mrf.mxu1 }
 0x6e7   : > { %v1051_v0 = vsel %vm424_vm7, %v1042_v63, 0.0 }
 0x6e8   : > { %1053 = vst [vmem:[%s178_s20] sm:$0xff] %v1051_v0 }
 0x6e9   : > { %1413 = shalt.err (!%p1410_p3)
}
 0x6ea   : > { %s1414_s6 = scalar_lea.hbm %s1704_s28, 256  ;;  %s1418_s9 = scalar_lea.hbm %s1750_s3, 512 }
 0x6eb   : > { %p1415_p4 = scmp.ne.s32.totalorder %s1704_s28, %s1414_s6  ;;  %p1419_p9 = scmp.lt.s32.totalorder %s1704_s28, %s1750_s3 }
 0x6ec   : > { %p1420_p10 = scmp.lt.s32.totalorder %s1418_s9, %s1414_s6 }
 0x6ed   : > { %p1416_p7 = pnand %p1415_p4, %p1530_p5 }
 0x6ee   : > { %p1421_p11 = por %p1420_p10, %p1419_p9 }
 0x6ef   : > { %p1417_p8 = pneg %p1416_p7 }
 0x6f1   : > { %p1422_p12 = pnand %p1421_p11, %p1417_p8 }
 0x6f3   : > { %1425 = shalt.err (!%p1422_p12)
}
 0x6f4   : > { %s1470_s17 = smov 128   ;;  %s1471_s19 = smov 8  }
 0x6f5   : > { %1349 = dma.vmem_to_hbm [thread:$0]  (%p1530_p5), %s1699_s24, 256, %s1704_s28, %s1707_s29, %s1470_s17, %s1470_s17, %s1471_s19  }
 0x6f6 PF: > { %p1355_p13 = scmp.ge.s32.totalorder %s1460_s15, 2  ;;  %s1084_s20 = sand.u32 1, %s1448_s12  }
 0x6f7   : > { %s1085_s25 = scalar_lea.sflag [#allocation3], %s1084_s20 }
 0x6f8   : > { %p1352_p0 = pnand %p1355_p13, %p1534_p6 }
 0x6fa   : > { %p1353_p1 = pneg %p1352_p0 }
 0x6fc   : > { %1443 = dma.done.wait (%p1353_p1), %s1085_s25, 256  }
 0x6fd   : > { %1445 = vsyncadd (%p1353_p1), %s1085_s25, 4294967040  ;;  %p13_p2 = scmp.ge.s32.totalorder %s1517_s18, 4   ;;  %s1753_s12 = smov %s1452_s13 }
 0x6fe   : > { %s1754_s13 = smov %s1456_s14  ;;  %s1755_s14 = smov %s1528_s21 }
 0x6ff   : > { %s1756_s15 = smov %s1517_s18  ;;  %15 = sbr.rel (!%p13_p2) target bundleno = 3 (0x3), region = 70 }
 0x704   :  { %1090 = vsyncpa [#allocation3], 1 }
 0x705   :  { %1092 = vsyncpa [#allocation3 + $0x1], 1 }

</bundles_post_ra>
